<compile_context>
chip_gen: v7x
topology: tpu7x:2x2x1
jax: 0.10.0
libtpu: 0.0.40
codegen_flags: <defaults>
</compile_context>

<pallas_src>
import jax
import jax.numpy as jnp
from jax.experimental import pallas as pl
from jax.experimental.pallas import tpu as pltpu


def make_decoder_kernel(n_rest_layers):
    """Kernel: Linear+ReLU stack (bf16 MXU, f32 accum) -> fused mu|logvar head."""

    def kernel(x_ref, w0_ref, b0_ref, *refs):
        # refs layout: (w_i, b_i) * n_rest_layers, w_head, b_head, out_ref
        # First layer on the pre-concatenated [codes | conditions] input.
        h = jnp.dot(x_ref[...], w0_ref[...],
                    preferred_element_type=jnp.float32) + b0_ref[...]
        h = jnp.maximum(h, 0.0)

        idx = 0
        for _ in range(n_rest_layers):
            w = refs[idx][...]
            b = refs[idx + 1][...]
            idx += 2
            h = jnp.dot(h.astype(w.dtype), w,
                        preferred_element_type=jnp.float32) + b
            h = jnp.maximum(h, 0.0)

        # Fused mu|logvar head: single matmul, single lane-dense store
        # (head output dim is padded to a multiple of 128 host-side).
        w_head = refs[idx][...]
        b_head = refs[idx + 1][...]
        out_ref = refs[idx + 2]
        out_ref[...] = (jnp.dot(h.astype(w_head.dtype), w_head,
                                preferred_element_type=jnp.float32)
                        + b_head).astype(out_ref.dtype)

    return kernel


def init_decoder_params(key, input_size, hidden_sizes, num_domains):
    """Deterministic init, mirroring the shapes produced by Decoder.__init__."""
    hs_rev = hidden_sizes[::-1]
    seq_dims = []
    for i, out_size in enumerate(hs_rev[:-1]):
        in_dim = out_size + num_domains if i == 0 else out_size
        seq_dims.append((in_dim, hs_rev[i + 1]))

    def lin_init(k, fan_in, fan_out):
        kw, kb = jax.random.split(k)
        bound = 1.0 / jnp.sqrt(jnp.float32(fan_in))
        w = jax.random.uniform(kw, (fan_in, fan_out), jnp.float32, -bound, bound)
        b = jax.random.uniform(kb, (1, fan_out), jnp.float32, -bound, bound)
        return w, b

    keys = jax.random.split(key, len(seq_dims) + 2)
    seq_params = [lin_init(keys[i], di, do) for i, (di, do) in enumerate(seq_dims)]
    mu_params = lin_init(keys[-2], hidden_sizes[0], input_size)
    lv_params = lin_init(keys[-1], hidden_sizes[0], input_size)
    return seq_params, mu_params, lv_params


def _round_up(a, m):
    return ((a + m - 1) // m) * m


def prepare_decoder_params(params):
    """One-time host-side repack.

    * fuse mu|logvar into a single head and pad its output dim to a multiple
      of 128 (lane-dense store for any input_size),
    * cast all weights to bf16 (MXU operands), keep biases f32 (added to the
      f32 accumulator).
    Returns ((w0, b0), rest, (w_head, b_head), out2) where out2 = 2*input_size.
    """
    seq_params, (w_mu, b_mu), (w_lv, b_lv) = params
    w_head = jnp.concatenate([w_mu, w_lv], axis=1)   # (hidden0, 2*input_size)
    b_head = jnp.concatenate([b_mu, b_lv], axis=1)   # (1, 2*input_size)
    out2 = w_head.shape[1]
    out2_pad = _round_up(out2, 128)
    if out2_pad != out2:
        w_head = jnp.pad(w_head, ((0, 0), (0, out2_pad - out2)))
        b_head = jnp.pad(b_head, ((0, 0), (0, out2_pad - out2)))

    def cvt(w, b):
        return w.astype(jnp.bfloat16), b.astype(jnp.float32)

    first = cvt(*seq_params[0])
    rest = tuple(cvt(w, b) for (w, b) in seq_params[1:])
    head = (w_head.astype(jnp.bfloat16), b_head.astype(jnp.float32))
    return first, rest, head, out2


def decoder_forward(codes, conditions, prepped, *, block_batch=2048):
    """Pallas implementation of Decoder.forward using pre-packed params."""
    (w0, b0), rest, (w_head, b_head), out2 = prepped
    input_size = out2 // 2
    out2_pad = w_head.shape[1]
    B = codes.shape[0]
    in_dim = codes.shape[1] + conditions.shape[1]

    # Wrapper-side concat (tiny HBM traffic) keeps layer 0 a single MXU pass.
    x = jnp.concatenate(
        [codes.astype(jnp.float32), conditions.astype(jnp.float32)],
        axis=1).astype(jnp.bfloat16)

    # Batch tile: multiple of 8 (f32 sublanes), large by default so the
    # ~0.35us per-grid-step overhead is amortized.
    b8 = _round_up(max(B, 1), 8)
    tb = max(8, (min(block_batch, b8) // 8) * 8)
    if b8 <= tb:
        if b8 >= 16:
            # Guarantee >= 2 grid steps so the "parallel" batch axis can shard
            # across both TensorCores on v7x (harmless on v5e/v6e).
            tb = _round_up((b8 + 1) // 2, 8)
            b_pad = 2 * tb
        else:
            tb = b8
            b_pad = b8
    else:
        b_pad = _round_up(b8, tb)
    if b_pad != B:
        x = jnp.pad(x, ((0, b_pad - B), (0, 0)))

    inputs = [x, w0, b0]
    for w, b in rest:
        inputs.extend([w, b])
    inputs.extend([w_head, b_head])

    def resident(arr):
        # Weights/biases: full-extent block, constant index_map -> stay
        # VMEM-resident across all batch-grid steps.
        return pl.BlockSpec(arr.shape, lambda i: (0, 0))

    in_specs = [pl.BlockSpec((tb, in_dim), lambda i: (i, 0))] + \
               [resident(a) for a in inputs[1:]]
    out_spec = pl.BlockSpec((tb, out2_pad), lambda i: (i, 0))

    kernel = make_decoder_kernel(len(rest))
    out = pl.pallas_call(
        kernel,
        out_shape=jax.ShapeDtypeStruct((b_pad, out2_pad), jnp.float32),
        grid=(b_pad // tb,),
        in_specs=in_specs,
        out_specs=out_spec,
        compiler_params=pltpu.CompilerParams(
            dimension_semantics=("parallel",)),
    )(*inputs)

    out = out[:B]
    return out[:, :input_size], out[:, input_size:out2]


def decoder_forward_ref(codes, conditions, params):
    """Pure-JAX f32 reference (raw, un-fused parameters)."""
    seq_params, (w_mu, b_mu), (w_lv, b_lv) = params
    h = jnp.concatenate([codes, conditions], axis=1).astype(jnp.float32)
    for w, b in seq_params:
        h = jnp.maximum(h @ w + b, 0.0)
    return h @ w_mu + b_mu, h @ w_lv + b_lv


def decoder_forward_ref_bf16(codes, conditions, prepped):
    """Pure-JAX reference replicating the kernel's bf16-operand / f32-accum math."""
    (w0, b0), rest, (w_head, b_head), out2 = prepped
    input_size = out2 // 2
    x = jnp.concatenate(
        [codes.astype(jnp.float32), conditions.astype(jnp.float32)],
        axis=1).astype(jnp.bfloat16)
    h = jnp.maximum(
        jnp.dot(x, w0, preferred_element_type=jnp.float32) + b0, 0.0)
    for w, b in rest:
        h = jnp.maximum(
            jnp.dot(h.astype(jnp.bfloat16), w,
                    preferred_element_type=jnp.float32) + b, 0.0)
    out = jnp.dot(h.astype(jnp.bfloat16), w_head,
                  preferred_element_type=jnp.float32) + b_head
    return out[:, :input_size], out[:, input_size:out2]


if __name__ == "__main__":
    # Small shapes consistent with the module:
    #   hidden_sizes = [32, 24, 16]  => latent dim D = hidden_sizes[-1] = 16
    #   num_domains  = 4
    #   input_size   = channels * height * width = 4 * 4 * 4 = 64
    input_size = 64
    hidden_sizes = [32, 24, 16]
    num_domains = 4
    batch = 2
    latent_dim = hidden_sizes[-1]

    key = jax.random.PRNGKey(0)
    k_params, k_codes, k_cond = jax.random.split(key, 3)

    params = init_decoder_params(k_params, input_size, hidden_sizes, num_domains)
    prepped = prepare_decoder_params(params)

    codes = jax.random.normal(k_codes, (batch, latent_dim), jnp.float32)
    cond_idx = jax.random.randint(k_cond, (batch,), 0, num_domains)
    conditions = jax.nn.one_hot(cond_idx, num_domains, dtype=jnp.float32)

    mu, logvar = decoder_forward(codes, conditions, prepped)
    jax.block_until_ready((mu, logvar))

    assert mu.shape == (batch, input_size) and logvar.shape == (batch, input_size)

    # Tight check vs. a reference that mirrors the kernel's bf16/f32 math.
    mu_b, lv_b = decoder_forward_ref_bf16(codes, conditions, prepped)
    assert jnp.allclose(mu, mu_b, atol=1e-3, rtol=1e-3)
    assert jnp.allclose(logvar, lv_b, atol=1e-3, rtol=1e-3)

    # Loose check vs. the full-f32 reference (bf16 MXU operands).
    mu_ref, lv_ref = decoder_forward_ref(codes, conditions, params)
    assert jnp.allclose(mu, mu_ref, atol=3e-2, rtol=3e-2)
    assert jnp.allclose(logvar, lv_ref, atol=3e-2, rtol=3e-2)

    print("KERNEL_OK")
</pallas_src>

<mosaic_0001>
module attributes {stable_mosaic.version = 11 : i64} {
  func.func @kernel(%arg0: i32, %arg1: memref<8x20xbf16, #tpu.memory_space<vmem>>, %arg2: memref<20x24xbf16, #tpu.memory_space<vmem>>, %arg3: memref<1x24xf32, #tpu.memory_space<vmem>>, %arg4: memref<24x32xbf16, #tpu.memory_space<vmem>>, %arg5: memref<1x32xf32, #tpu.memory_space<vmem>>, %arg6: memref<32x128xbf16, #tpu.memory_space<vmem>>, %arg7: memref<1x128xf32, #tpu.memory_space<vmem>>, %arg8: memref<8x128xf32, #tpu.memory_space<vmem>>) attributes {dimension_semantics = [#tpu.dimension_semantics<parallel>], iteration_bounds = array<i64: 1>, scalar_prefetch = 0 : i64, scratch_operands = 0 : i64, tpu.core_type = #tpu.core_type<tc>, window_params = [{transform_indices = @transform_0, window_bounds = array<i64: 8, 20>}, {pipeline_mode = #tpu.pipeline_mode<synchronous>, transform_indices = @transform_1, window_bounds = array<i64: 20, 24>}, {pipeline_mode = #tpu.pipeline_mode<synchronous>, transform_indices = @transform_2, window_bounds = array<i64: 1, 24>}, {pipeline_mode = #tpu.pipeline_mode<synchronous>, transform_indices = @transform_3, window_bounds = array<i64: 24, 32>}, {pipeline_mode = #tpu.pipeline_mode<synchronous>, transform_indices = @transform_4, window_bounds = array<i64: 1, 32>}, {pipeline_mode = #tpu.pipeline_mode<synchronous>, transform_indices = @transform_5, window_bounds = array<i64: 32, 128>}, {pipeline_mode = #tpu.pipeline_mode<synchronous>, transform_indices = @transform_6, window_bounds = array<i64: 1, 128>}, {transform_indices = @transform_7, window_bounds = array<i64: 8, 128>}]} {
    %c0 = arith.constant 0 : index
    %c0_0 = arith.constant 0 : index
    %0 = vector.load %arg1[%c0, %c0_0] : memref<8x20xbf16, #tpu.memory_space<vmem>>, vector<8x20xbf16>
    %c0_1 = arith.constant 0 : index
    %c0_2 = arith.constant 0 : index
    %1 = vector.load %arg2[%c0_1, %c0_2] : memref<20x24xbf16, #tpu.memory_space<vmem>>, vector<20x24xbf16>
    %cst = arith.constant dense<0.000000e+00> : vector<8x24xf32>
    %2 = tpu.matmul %0, %1, %cst {dimension_numbers = #tpu.dot_dimension_numbers<[1], [0], [0], [1], [0, 0, 1, 1], [], []>} : vector<8x20xbf16>, vector<20x24xbf16>, vector<8x24xf32> -> vector<8x24xf32>
    %c0_3 = arith.constant 0 : index
    %c0_4 = arith.constant 0 : index
    %3 = vector.load %arg3[%c0_3, %c0_4] : memref<1x24xf32, #tpu.memory_space<vmem>>, vector<1x24xf32>
    %4 = vector.broadcast %3 : vector<1x24xf32> to vector<8x24xf32>
    %5 = arith.addf %2, %4 : vector<8x24xf32>
    %cst_5 = arith.constant 0.000000e+00 : f32
    %6 = vector.broadcast %cst_5 : f32 to vector<8x24xf32>
    %7 = arith.maximumf %5, %6 : vector<8x24xf32>
    %c0_6 = arith.constant 0 : index
    %c0_7 = arith.constant 0 : index
    %8 = vector.load %arg4[%c0_6, %c0_7] : memref<24x32xbf16, #tpu.memory_space<vmem>>, vector<24x32xbf16>
    %c0_8 = arith.constant 0 : index
    %c0_9 = arith.constant 0 : index
    %9 = vector.load %arg5[%c0_8, %c0_9] : memref<1x32xf32, #tpu.memory_space<vmem>>, vector<1x32xf32>
    %10 = arith.truncf %7 : vector<8x24xf32> to vector<8x24xbf16>
    %cst_10 = arith.constant dense<0.000000e+00> : vector<8x32xf32>
    %11 = tpu.matmul %10, %8, %cst_10 {dimension_numbers = #tpu.dot_dimension_numbers<[1], [0], [0], [1], [0, 0, 1, 1], [], []>} : vector<8x24xbf16>, vector<24x32xbf16>, vector<8x32xf32> -> vector<8x32xf32>
    %12 = vector.broadcast %9 : vector<1x32xf32> to vector<8x32xf32>
    %13 = arith.addf %11, %12 : vector<8x32xf32>
    %cst_11 = arith.constant 0.000000e+00 : f32
    %14 = vector.broadcast %cst_11 : f32 to vector<8x32xf32>
    %15 = arith.maximumf %13, %14 : vector<8x32xf32>
    %c0_12 = arith.constant 0 : index
    %c0_13 = arith.constant 0 : index
    %16 = vector.load %arg6[%c0_12, %c0_13] : memref<32x128xbf16, #tpu.memory_space<vmem>>, vector<32x128xbf16>
    %c0_14 = arith.constant 0 : index
    %c0_15 = arith.constant 0 : index
    %17 = vector.load %arg7[%c0_14, %c0_15] : memref<1x128xf32, #tpu.memory_space<vmem>>, vector<1x128xf32>
    %18 = arith.truncf %15 : vector<8x32xf32> to vector<8x32xbf16>
    %cst_16 = arith.constant dense<0.000000e+00> : vector<8x128xf32>
    %19 = tpu.matmul %18, %16, %cst_16 {dimension_numbers = #tpu.dot_dimension_numbers<[1], [0], [0], [1], [0, 0, 1, 1], [], []>} : vector<8x32xbf16>, vector<32x128xbf16>, vector<8x128xf32> -> vector<8x128xf32>
    %20 = vector.broadcast %17 : vector<1x128xf32> to vector<8x128xf32>
    %21 = arith.addf %19, %20 : vector<8x128xf32>
    %c0_17 = arith.constant 0 : index
    %c0_18 = arith.constant 0 : index
    %22 = vector.load %arg8[%c0_17, %c0_18] : memref<8x128xf32, #tpu.memory_space<vmem>>, vector<8x128xf32>
    tpu.vector_store %arg8[%c0_17, %c0_18], %21 {strides = array<i32>} : memref<8x128xf32, #tpu.memory_space<vmem>>, vector<8x128xf32>,
    return
  }
  func.func @transform_0(%arg0: i32) -> (i32, i32) {
    %c0_i32 = arith.constant 0 : i32
    %c0_i32_0 = arith.constant 0 : i32
    return %arg0, %c0_i32 : i32, i32
  }
  func.func @transform_1(%arg0: i32) -> (i32, i32) {
    %c0_i32 = arith.constant 0 : i32
    %c0_i32_0 = arith.constant 0 : i32
    %c0_i32_1 = arith.constant 0 : i32
    return %c0_i32, %c0_i32_0 : i32, i32
  }
  func.func @transform_2(%arg0: i32) -> (i32, i32) {
    %c0_i32 = arith.constant 0 : i32
    %c0_i32_0 = arith.constant 0 : i32
    %c0_i32_1 = arith.constant 0 : i32
    return %c0_i32, %c0_i32_0 : i32, i32
  }
  func.func @transform_3(%arg0: i32) -> (i32, i32) {
    %c0_i32 = arith.constant 0 : i32
    %c0_i32_0 = arith.constant 0 : i32
    %c0_i32_1 = arith.constant 0 : i32
    return %c0_i32, %c0_i32_0 : i32, i32
  }
  func.func @transform_4(%arg0: i32) -> (i32, i32) {
    %c0_i32 = arith.constant 0 : i32
    %c0_i32_0 = arith.constant 0 : i32
    %c0_i32_1 = arith.constant 0 : i32
    return %c0_i32, %c0_i32_0 : i32, i32
  }
  func.func @transform_5(%arg0: i32) -> (i32, i32) {
    %c0_i32 = arith.constant 0 : i32
    %c0_i32_0 = arith.constant 0 : i32
    %c0_i32_1 = arith.constant 0 : i32
    return %c0_i32, %c0_i32_0 : i32, i32
  }
  func.func @transform_6(%arg0: i32) -> (i32, i32) {
    %c0_i32 = arith.constant 0 : i32
    %c0_i32_0 = arith.constant 0 : i32
    %c0_i32_1 = arith.constant 0 : i32
    return %c0_i32, %c0_i32_0 : i32, i32
  }
  func.func @transform_7(%arg0: i32) -> (i32, i32) {
    %c0_i32 = arith.constant 0 : i32
    %c0_i32_0 = arith.constant 0 : i32
    return %arg0, %c0_i32 : i32, i32
  }
}

</mosaic_0001>

<bundles_post_ra>
// kernel: tpu_custom_call.1
= control target key start
LH: loop header
LB: loop body
LE: loop exit
PB: predicated region body
PF: predicated region fallthrough
CT: control target
= control target key end

     0   :  { %12 = vsyncpa [#allocation3], 0  ;;  %s560_s0 = inlined_call_operand.hbm [shape: bf16[8,20], index: 0, kind: input, shape index: {}]   ;;  %s561_s1 = inlined_call_operand.hbm [shape: bf16[20,24], index: 1, kind: input, shape index: {}]   ;;  %s562_s2 = inlined_call_operand.vmem [shape: f32[1,24], index: 2, kind: input, shape index: {}]   ;;  %s563_s3 = inlined_call_operand.hbm [shape: bf16[24,32], index: 3, kind: input, shape index: {}]   ;;  %s564_s4 = inlined_call_operand.vmem [shape: f32[1,32], index: 4, kind: input, shape index: {}]   ;;  %s565_s5 = inlined_call_operand.vmem [shape: bf16[32,128], index: 5, kind: input, shape index: {}]   ;;  %s566_s6 = inlined_call_operand.vmem [shape: f32[1,128], index: 6, kind: input, shape index: {}]   ;;  %s567_s7 = inlined_call_operand.hbm [shape: f32[8,128], index: 7, kind: output, shape index: {}]  }
   0x1   :  { %13 = vsyncpa [#allocation6], 0 }
   0x2   :  { %14 = vsyncpa [#allocation4], 0  ;;  %s443_s24 = smov [#allocation5]   ;;  %s349_s28 = scalar_lea.hbm %s561_s1, 192 }
   0x3   :  { %s30_s25 = sshll.u32 %s443_s24, 4  ;;  %p350_p0 = scmp.ne.s32.totalorder %s561_s1, %s349_s28  ;;  %s31_s25 = int_to_ptr.vmem [resolvable:$true] %s30_s25 }
   0x4   :  { %p353_p1 = scmp.lt.u32.totalorder %s349_s28, %s561_s1 }
   0x6   :  { %p355_p2 = pnand %p353_p1, %p350_p0 }
   0x8   :  { %358 = shalt.err (!%p355_p2)
}
   0x9   :  { %s359_s10 = scalar_lea.vmem %s31_s25, 192  ;;  %p364_p4 = scmp.lt.s32.totalorder %s31_s25, %s31_s25 }
   0xa   :  { %p360_p3 = scmp.ne.s32.totalorder %s31_s25, %s359_s10  ;;  %p365_p5 = scmp.lt.s32.totalorder %s359_s10, %s359_s10 }
   0xc   :  { %p366_p6 = por %p365_p5, %p364_p4 }
   0xe   :  { %p367_p7 = pnand %p366_p6, %p360_p3 }
  0x10   :  { %370 = shalt.err (!%p367_p7)
}
  0x11   :  { %s444_s11 = smov 64   ;;  %s445_s12 = smov 4  }
  0x12   :  { %36 = dma.hbm_to_vmem [thread:$0]  %s561_s1, 192, %s31_s25, [#allocation6], %s444_s11, %s444_s11, %s445_s12  }
  0x13   :  { %s446_s15 = smov [#allocation2]   ;;  %s447_s17 = smov [#allocation7]  }
  0x14   :  { %s21_s16 = sshll.u32 %s446_s15, 4  ;;  %s44_s18 = sshll.u32 %s447_s17, 4  ;;  %s22_s16 = int_to_ptr.vmem [resolvable:$true] %s21_s16  ;;  %s45_s18 = int_to_ptr.vmem [resolvable:$true] %s44_s18 }
  0x15   :  { %s371_s21 = scalar_lea.hbm %s560_s0, 64 }
  0x16   :  { %p372_p8 = scmp.ne.s32.totalorder %s560_s0, %s371_s21  ;;  %p375_p9 = scmp.lt.u32.totalorder %s371_s21, %s560_s0 }
  0x18   :  { %p377_p10 = pnand %p375_p9, %p372_p8 }
  0x1a   :  { %380 = shalt.err (!%p377_p10)
}
  0x1b   :  { %s381_s1 = scalar_lea.vmem %s22_s16, 64  ;;  %p386_p12 = scmp.lt.s32.totalorder %s22_s16, %s22_s16 }
  0x1c   :  { %p382_p11 = scmp.ne.s32.totalorder %s22_s16, %s381_s1  ;;  %p387_p13 = scmp.lt.s32.totalorder %s381_s1, %s381_s1 }
  0x1e   :  { %p388_p0 = por %p387_p13, %p386_p12 }
  0x20   :  { %p389_p1 = pnand %p388_p0, %p382_p11 }
  0x22   :  { %392 = shalt.err (!%p389_p1)
}
  0x23   :  { %24 = dma.hbm_to_vmem [thread:$0]  %s560_s0, 64, %s22_s16, [#allocation3]  }
  0x24   :  { %s393_s30 = scalar_lea.hbm %s563_s3, 192 }
  0x25   :  { %p394_p2 = scmp.ne.s32.totalorder %s563_s3, %s393_s30  ;;  %p397_p3 = scmp.lt.u32.totalorder %s393_s30, %s563_s3 }
  0x27   :  { %p399_p4 = pnand %p397_p3, %p394_p2 }
  0x29   :  { %402 = shalt.err (!%p399_p4)
}
  0x2a   :  { %s403_s14 = scalar_lea.vmem %s45_s18, 192  ;;  %p408_p6 = scmp.lt.s32.totalorder %s45_s18, %s45_s18 }
  0x2b   :  { %p404_p5 = scmp.ne.s32.totalorder %s45_s18, %s403_s14  ;;  %p409_p7 = scmp.lt.s32.totalorder %s403_s14, %s403_s14 }
  0x2d   :  { %p410_p8 = por %p409_p7, %p408_p6 }
  0x2f   :  { %p411_p9 = pnand %p410_p8, %p404_p5 }
  0x31   :  { %414 = shalt.err (!%p411_p9)
}
  0x32   :  { %50 = dma.hbm_to_vmem [thread:$0]  %s563_s3, 192, %s45_s18, [#allocation6], %s444_s11, %s444_s11, %s445_s12  }
  0x33   :  { %437 = dma.done.wait [#allocation3], 64  }
  0x34   :  { %438 = vsyncadd [#allocation3], 4294967232 }
  0x35   :  { %439 = dma.done.wait [#allocation6], 384  }
  0x36   :  { %440 = vsyncadd [#allocation6], 4294966912  ;;  %v448_v0 = vmov 0.0   ;;  %vm449_vm0 = vmmov 0   ;;  %v343_v1 = vld [vmem:[#allocation5] sm:$0xff]   ;;  %vm91_vm1 = vcmask 1041408  }
  0x37   :  { %311 = vmatprep.subr.bf16.mxu0 %v448_v0  ;;  %315 = vmatprep.mubr.msk.bf16.mxu0 %vm449_vm0, %v448_v0  ;;  %v344_v2 = vld [vmem:[#allocation5 + $0x8] ss:$0 sps:$4 sm:$0x33]   ;;  %v67_v4 = vld [vmem:[#allocation2] sm:$0xf]  ;;  %vm87_vm2 = vcmask 162816  }
  0x38   :  { %319 = vmatprep.subr.bf16.mxu1 %v448_v0  ;;  %323 = vmatprep.mubr.msk.bf16.mxu1 %vm449_vm0, %v448_v0  ;;  %v93_v3 = vsel %vm91_vm1, %v344_v2, 0  ;;  %v345_v5 = vld [vmem:[#allocation7] sm:$0xff]   ;;  %v346_v6 = vld [vmem:[#allocation7 + $0x8] ss:$0 sps:$4 sm:$0xff]   ;;  %vm160_vm3 = vcmask 1043456   ;;  %vm156_vm4 = vcmask 195584  }
  0x39   :  { %312 = vmatpush3.bf16.msra.mxu0 %v343_v1  ;;  %320 = vmatpush3.bf16.msra.mxu1 %v345_v5  ;;  %v162_v7 = vsel %vm160_vm3, %v346_v6, 0  ;;  %v347_v8 = vld [vmem:[%s565_s5] sm:$0xff]   ;;  %v348_v17 = vld [vmem:[%s565_s5 + $0x8] sm:$0xff]   ;;  %vm229_vm5 = vcmask 261120   ;;  %s450_s22 = smov [#allocation8]  }
  0x3a   :  { %313 = vmatprep.subr.bf16.mxu0 %v448_v0  ;;  %321 = vmatprep.subr.bf16.mxu1 %v448_v0  ;;  %v290_v9 = vld [vmem:[%s562_s2] ss:$0 sm:$0xff]  ;;  %s280_s5 = sshll.u32 %s450_s22, 4  ;;  %s281_s5 = int_to_ptr.vmem [resolvable:$true] %s280_s5 }
  0x3b   :  { %v294_v18 = vld [vmem:[%s564_s4] ss:$0 sm:$0xff]  ;;  %s415_s4 = scalar_lea.vmem %s281_s5, 128  ;;  %p420_p11 = scmp.lt.s32.totalorder %s281_s5, %s281_s5 }
  0x3c   :  { %v298_v26 = vld [vmem:[%s566_s6] ss:$0 sm:$0xff]  ;;  %p416_p10 = scmp.ne.s32.totalorder %s281_s5, %s415_s4  ;;  %p421_p12 = scmp.lt.s32.totalorder %s415_s4, %s415_s4 }
  0x3d   :  { %314 = vmatpush3.bf16.msra.mxu0 %v93_v3  ;;  %322 = vmatpush3.bf16.msra.mxu1 %v162_v7 }
  0x3e   :  { %327 = vmatprep.subr.bf16.mxu0 %v448_v0  ;;  %p422_p13 = por %p421_p12, %p420_p11 }
  0x40   :  { %316 = vmatmul.mubr.msk.bf16.vlgmr.msra.gmra.mrb[0].mxu0 %vm87_vm2, %v67_v4  ;;  %p423_p0 = pnand %p422_p13, %p416_p10 }
  0x41   :  { %331 = vmatprep.mubr.msk.bf16.mxu0 %vm449_vm0, %v448_v0  ;;  %328 = vmatpush3.bf16.msra.mxu0 %v347_v8 }
  0x42   :  { %329 = vmatprep.subr.bf16.mxu0 %v448_v0 }
  0x45   :  { %330 = vmatpush3.bf16.msra.mxu0 %v348_v17 }
 0x113   :  { %v129_v10 = vpop.f32.mrb[0].mxu0 }
 0x114   :  { %v130_v11 = vadd.f32 %v290_v9, %v129_v10  ;;  %v317_v12 = vpop.f32.mrb[1].mxu0 }
 0x115   :  { %v132_v13 = vpop.f32.mrb[2].mxu0 }
 0x116   :  { %v135_v14 = vmax.f32 %v130_v11, 0.0  ;;  %v318_v15 = vpop.f32.mrb[3].mxu0 }
 0x118   :  { %v140_v16 = vpack.c.bf16 %v135_v14, %v135_v14 }
 0x11a   :  { %324 = vmatmul.mubr.msk.bf16.vlgmr.msra.gmra.mrb[0].mxu1 %vm156_vm4, %v140_v16 }
 0x1ed   :  { %v198_v19 = vpop.f32.mrb[0].mxu1 }
 0x1ee   :  { %v199_v20 = vadd.f32 %v294_v18, %v198_v19  ;;  %v325_v21 = vpop.f32.mrb[1].mxu1 }
 0x1ef   :  { %v201_v22 = vpop.f32.mrb[2].mxu1 }
 0x1f0   :  { %v204_v23 = vmax.f32 %v199_v20, 0.0  ;;  %v326_v24 = vpop.f32.mrb[3].mxu1 }
 0x1f2   :  { %v210_v25 = vpack.c.bf16 %v204_v23, %v204_v23 }
 0x1f4   :  { %332 = vmatmul.mubr.msk.bf16.vlgmr.msra.gmra.mrb[4].mxu0 %vm229_vm5, %v210_v25 }
 0x2c7   :  { %v267_v27 = vpop.f32.mrb[4].mxu0 }
 0x2c8   :  { %v268_v28 = vadd.f32 %v298_v26, %v267_v27  ;;  %v333_v29 = vpop.f32.mrb[5].mxu0 }
 0x2c9   :  { %v270_v30 = vpop.f32.mrb[6].mxu0 }
 0x2ca   :  { %273 = vst [vmem:[#allocation8] sm:$0xff] %v268_v28  ;;  %v334_v31 = vpop.f32.mrb[7].mxu0 }
 0x2cb   :  { %426 = shalt.err (!%p423_p0)
}
 0x2cc   :  { %s427_s6 = scalar_lea.hbm %s567_s7, 128 }
 0x2cd   :  { %p428_p1 = scmp.ne.s32.totalorder %s567_s7, %s427_s6  ;;  %p431_p2 = scmp.lt.u32.totalorder %s427_s6, %s567_s7 }
 0x2cf   :  { %p433_p3 = pnand %p431_p2, %p428_p1 }
 0x2d1   :  { %436 = shalt.err (!%p433_p3)
}
 0x2d2   :  { %283 = dma.vmem_to_hbm [thread:$0]  %s281_s5, 128, %s567_s7, [#allocation4]  }
 0x2d3   :  { %441 = dma.done.wait [#allocation4], 128  }
 0x2d4   :  { %442 = vsyncadd [#allocation4], 4294967168 }
 0x2d5   :  { %287 = vsyncpa [#allocation3], 1 }
 0x2d6   :  { %288 = vsyncpa [#allocation6], 1 }
 0x2d7   :  { %289 = vsyncpa [#allocation4], 1 }

</bundles_post_ra>
